<compile_context>
chip_gen: v6e
topology: v6e:2x2x1
jax: 0.10.0
libtpu: 0.0.40
codegen_flags: <defaults>
</compile_context>

<pallas_src>
import functools

import numpy as np
import jax
import jax.numpy as jnp
from jax.experimental import pallas as pl
from jax.experimental.pallas import tpu as pltpu

FLOAT_MIN = float(np.finfo(np.float32).min)  # matches rllib FLOAT_MIN


def _round_up(x, m):
    return ((x + m - 1) // m) * m


def _actionmask_kernel(obs_ref, mask_ref,
                       w1_ref, b1_ref, w2_ref, b2_ref, w3_ref, b3_ref,
                       out_ref):
    # Two hidden MLP layers (tanh) + logits head + mask add, all on the resident VMEM weights.
    h1 = jnp.tanh(jnp.dot(obs_ref[...], w1_ref[...],
                          preferred_element_type=jnp.float32) + b1_ref[...])
    h2 = jnp.tanh(jnp.dot(h1, w2_ref[...],
                          preferred_element_type=jnp.float32) + b2_ref[...])
    logits = jnp.dot(h2, w3_ref[...],
                     preferred_element_type=jnp.float32) + b3_ref[...]
    # Exact reference semantics: clamp(log(mask), min=FLOAT_MIN).  Valid for soft masks too;
    # the log/tanh use the EUP slot, which is otherwise idle in this DMA-bound kernel.
    inf_mask = jnp.maximum(jnp.log(mask_ref[...]), FLOAT_MIN)
    out_ref[...] = (logits + inf_mask).astype(out_ref.dtype)


def _resident_spec(shape, index_map):
    # Constant index_map -> same block every grid step (fetched once, stays resident).
    # Buffered(1) turns off double-buffering for these weights (halves their VMEM footprint).
    try:
        return pl.BlockSpec(shape, index_map, pipeline_mode=pl.Buffered(1))
    except TypeError:  # older jax without pipeline_mode kwarg
        return pl.BlockSpec(shape, index_map)


def pad_params(params):
    """One-time prep: cast to f32 and zero-pad lane dims (obs D, action A) to multiples of 128."""
    f32 = jnp.float32
    D, H = params["w1"].shape
    A = params["w3"].shape[1]
    Dp, Ap = _round_up(D, 128), _round_up(A, 128)
    return {
        "w1": jnp.pad(params["w1"].astype(f32), ((0, Dp - D), (0, 0))),
        "b1": params["b1"].astype(f32).reshape(1, H),
        "w2": params["w2"].astype(f32),
        "b2": params["b2"].astype(f32).reshape(1, H),
        "w3": jnp.pad(params["w3"].astype(f32), ((0, 0), (0, Ap - A))),
        "b3": jnp.pad(params["b3"].astype(f32).reshape(1, A), ((0, 0), (0, Ap - A))),
    }


@functools.partial(jax.jit, static_argnames=("batch_tile",))
def action_mask_model_forward(obs, action_mask, padded_params, batch_tile=512):
    """obs: (B, D) flattened observations; action_mask: (B, A); padded_params from pad_params()."""
    B, D = obs.shape
    A = action_mask.shape[1]
    Dp, H = padded_params["w1"].shape
    Ap = padded_params["w3"].shape[1]

    # Batch tiling: grow TB with B (amortizes ~0.35 us/step overhead), but keep >= 2 grid
    # steps whenever possible so ("parallel",) can shard the batch across v7x's two TCs.
    Bp8 = _round_up(B, 8)
    TB = min(batch_tile, Bp8)
    if Bp8 >= 16:
        TB = min(TB, _round_up((Bp8 + 1) // 2, 8))
    Bp = _round_up(B, TB)

    f32 = jnp.float32
    obs_p = jnp.pad(obs.astype(f32), ((0, Bp - B), (0, Dp - D)))
    mask_p = jnp.pad(action_mask.astype(f32), ((0, Bp - B), (0, Ap - A)))

    grid = (Bp // TB,)
    row = lambda i: (i, 0)     # batch-tiled inputs / output
    const = lambda i: (0, 0)   # weights/biases: same block every step

    # VMEM budget: weights single-buffered (Buffered(1)) + double-buffered obs/mask/out tiles
    # + headroom for compiler-internal scratch.
    weight_bytes = 4 * (Dp * H + H + H * H + H + H * Ap + Ap)
    io_tile_bytes = 4 * TB * (Dp + 2 * Ap)
    vmem_needed = weight_bytes + 2 * io_tile_bytes + (4 << 20)
    try:
        phys_vmem = int(pltpu.get_tpu_info().vmem_capacity_bytes)
    except Exception:  # query unavailable -> assume the smaller (v7x-class) VMEM
        phys_vmem = 64 << 20
    hard_cap = (56 << 20) if phys_vmem <= (64 << 20) else (100 << 20)
    vmem_limit = int(min(max(vmem_needed, 16 << 20), hard_cap))

    cost = pl.CostEstimate(
        flops=int(2 * Bp * (Dp * H + H * H + H * Ap)),
        transcendentals=int(2 * Bp * H + Bp * Ap),
        bytes_accessed=int(4 * (Bp * Dp + 2 * Bp * Ap) + weight_bytes),
    )

    out_p = pl.pallas_call(
        _actionmask_kernel,
        out_shape=jax.ShapeDtypeStruct((Bp, Ap), jnp.float32),
        grid=grid,
        in_specs=[
            pl.BlockSpec((TB, Dp), row),          # obs tile
            pl.BlockSpec((TB, Ap), row),          # action_mask tile
            _resident_spec((Dp, H), const),       # w1 (resident, single-buffered)
            _resident_spec((1, H), const),        # b1
            _resident_spec((H, H), const),        # w2
            _resident_spec((1, H), const),        # b2
            _resident_spec((H, Ap), const),       # w3 (A padded to lane width)
            _resident_spec((1, Ap), const),       # b3
        ],
        out_specs=pl.BlockSpec((TB, Ap), row),
        compiler_params=pltpu.CompilerParams(
            dimension_semantics=("parallel",),
            vmem_limit_bytes=vmem_limit,
        ),
        cost_estimate=cost,
    )(obs_p, mask_p,
      padded_params["w1"], padded_params["b1"],
      padded_params["w2"], padded_params["b2"],
      padded_params["w3"], padded_params["b3"])

    return out_p[:B, :A]


def make_params(key, obs_dim, hidden, num_outputs):
    ks = jax.random.split(key, 6)
    # Weights stored (in, out) = PyTorch Linear weight transposed.
    def lin(k, fan_in, fan_out):
        bound = 1.0 / np.sqrt(fan_in)
        return jax.random.uniform(k, (fan_in, fan_out), jnp.float32, -bound, bound)
    return {
        "w1": lin(ks[0], obs_dim, hidden),
        "b1": jax.random.uniform(ks[1], (1, hidden), jnp.float32, -0.01, 0.01),
        "w2": lin(ks[2], hidden, hidden),
        "b2": jax.random.uniform(ks[3], (1, hidden), jnp.float32, -0.01, 0.01),
        "w3": lin(ks[4], hidden, num_outputs),
        "b3": jax.random.uniform(ks[5], (1, num_outputs), jnp.float32, -0.01, 0.01),
    }


def _reference_forward(obs, action_mask, params):
    # Matches the PyTorch module: clamp(log(mask), min=FLOAT_MIN) added to the MLP logits.
    h1 = jnp.tanh(obs @ params["w1"] + params["b1"])
    h2 = jnp.tanh(h1 @ params["w2"] + params["b2"])
    logits = h2 @ params["w3"] + params["b3"]
    inf_mask = jnp.maximum(jnp.log(action_mask), FLOAT_MIN)
    return logits + inf_mask


if __name__ == "__main__":
    # Dict obs {observations: (B, D), action_mask: (B, A)}.  B=256 exercises the batch grid
    # (two tiles of 128 via the >=2-steps rule); D=64 and A=32 are lane-padded to 128.
    B, D, H, A = 256, 64, 128, 32  # batch, obs_dim, fcnet_hidden, num_outputs (= action-space size)

    key = jax.random.PRNGKey(0)
    k_obs, k_mask, k_par = jax.random.split(key, 3)

    obs = jax.random.normal(k_obs, (B, D), jnp.float32)
    # Binary action mask with at least one legal action per row.
    mask = (jax.random.uniform(k_mask, (B, A)) > 0.5).astype(jnp.float32)
    mask = mask.at[:, 0].set(1.0)

    params = make_params(k_par, D, H, A)
    padded_params = pad_params(params)          # one-time; not part of the per-call path

    out = action_mask_model_forward(obs, mask, padded_params)
    out = jax.block_until_ready(out)

    ref = _reference_forward(obs, mask, params)
    np.testing.assert_allclose(np.asarray(out), np.asarray(ref), rtol=2e-5, atol=2e-5)

    # TODO(synk): value_function() head of the internal TorchFC model is a separate branch not
    # exercised by forward(); the no_masking=True path is a trivial passthrough and omitted.
    print("KERNEL_OK")
</pallas_src>

<mosaic_0001>
module attributes {stable_mosaic.version = 11 : i64} {
  func.func @_actionmask_kernel(%arg0: i32, %arg1: memref<128x128xf32, #tpu.memory_space<vmem>>, %arg2: memref<128x128xf32, #tpu.memory_space<vmem>>, %arg3: memref<128x128xf32, #tpu.memory_space<vmem>>, %arg4: memref<1x128xf32, #tpu.memory_space<vmem>>, %arg5: memref<128x128xf32, #tpu.memory_space<vmem>>, %arg6: memref<1x128xf32, #tpu.memory_space<vmem>>, %arg7: memref<128x128xf32, #tpu.memory_space<vmem>>, %arg8: memref<1x128xf32, #tpu.memory_space<vmem>>, %arg9: memref<128x128xf32, #tpu.memory_space<vmem>>) attributes {dimension_semantics = [#tpu.dimension_semantics<parallel>], iteration_bounds = array<i64: 2>, scalar_prefetch = 0 : i64, scratch_operands = 0 : i64, tpu.core_type = #tpu.core_type<tc>, window_params = [{transform_indices = @transform_0, window_bounds = array<i64: 128, 128>}, {transform_indices = @transform_1, window_bounds = array<i64: 128, 128>}, {pipeline_mode = #tpu.pipeline_mode<synchronous>, transform_indices = @transform_2, window_bounds = array<i64: 128, 128>}, {pipeline_mode = #tpu.pipeline_mode<synchronous>, transform_indices = @transform_3, window_bounds = array<i64: 1, 128>}, {pipeline_mode = #tpu.pipeline_mode<synchronous>, transform_indices = @transform_4, window_bounds = array<i64: 128, 128>}, {pipeline_mode = #tpu.pipeline_mode<synchronous>, transform_indices = @transform_5, window_bounds = array<i64: 1, 128>}, {pipeline_mode = #tpu.pipeline_mode<synchronous>, transform_indices = @transform_6, window_bounds = array<i64: 128, 128>}, {pipeline_mode = #tpu.pipeline_mode<synchronous>, transform_indices = @transform_7, window_bounds = array<i64: 1, 128>}, {transform_indices = @transform_8, window_bounds = array<i64: 128, 128>}]} {
    %c0 = arith.constant 0 : index
    %c0_0 = arith.constant 0 : index
    %0 = vector.load %arg1[%c0, %c0_0] : memref<128x128xf32, #tpu.memory_space<vmem>>, vector<128x128xf32>
    %c0_1 = arith.constant 0 : index
    %c0_2 = arith.constant 0 : index
    %1 = vector.load %arg3[%c0_1, %c0_2] : memref<128x128xf32, #tpu.memory_space<vmem>>, vector<128x128xf32>
    %cst = arith.constant dense<0.000000e+00> : vector<128x128xf32>
    %2 = tpu.matmul %0, %1, %cst {dimension_numbers = #tpu.dot_dimension_numbers<[1], [0], [0], [1], [0, 0, 1, 1], [], []>} : vector<128x128xf32>, vector<128x128xf32>, vector<128x128xf32> -> vector<128x128xf32>
    %c0_3 = arith.constant 0 : index
    %c0_4 = arith.constant 0 : index
    %3 = vector.load %arg4[%c0_3, %c0_4] : memref<1x128xf32, #tpu.memory_space<vmem>>, vector<1x128xf32>
    %4 = vector.broadcast %3 : vector<1x128xf32> to vector<128x128xf32>
    %5 = arith.addf %2, %4 : vector<128x128xf32>
    %6 = math.tanh %5 : vector<128x128xf32>
    %c0_5 = arith.constant 0 : index
    %c0_6 = arith.constant 0 : index
    %7 = vector.load %arg5[%c0_5, %c0_6] : memref<128x128xf32, #tpu.memory_space<vmem>>, vector<128x128xf32>
    %cst_7 = arith.constant dense<0.000000e+00> : vector<128x128xf32>
    %8 = tpu.matmul %6, %7, %cst_7 {dimension_numbers = #tpu.dot_dimension_numbers<[1], [0], [0], [1], [0, 0, 1, 1], [], []>} : vector<128x128xf32>, vector<128x128xf32>, vector<128x128xf32> -> vector<128x128xf32>
    %c0_8 = arith.constant 0 : index
    %c0_9 = arith.constant 0 : index
    %9 = vector.load %arg6[%c0_8, %c0_9] : memref<1x128xf32, #tpu.memory_space<vmem>>, vector<1x128xf32>
    %10 = vector.broadcast %9 : vector<1x128xf32> to vector<128x128xf32>
    %11 = arith.addf %8, %10 : vector<128x128xf32>
    %12 = math.tanh %11 : vector<128x128xf32>
    %c0_10 = arith.constant 0 : index
    %c0_11 = arith.constant 0 : index
    %13 = vector.load %arg7[%c0_10, %c0_11] : memref<128x128xf32, #tpu.memory_space<vmem>>, vector<128x128xf32>
    %cst_12 = arith.constant dense<0.000000e+00> : vector<128x128xf32>
    %14 = tpu.matmul %12, %13, %cst_12 {dimension_numbers = #tpu.dot_dimension_numbers<[1], [0], [0], [1], [0, 0, 1, 1], [], []>} : vector<128x128xf32>, vector<128x128xf32>, vector<128x128xf32> -> vector<128x128xf32>
    %c0_13 = arith.constant 0 : index
    %c0_14 = arith.constant 0 : index
    %15 = vector.load %arg8[%c0_13, %c0_14] : memref<1x128xf32, #tpu.memory_space<vmem>>, vector<1x128xf32>
    %16 = vector.broadcast %15 : vector<1x128xf32> to vector<128x128xf32>
    %17 = arith.addf %14, %16 : vector<128x128xf32>
    %c0_15 = arith.constant 0 : index
    %c0_16 = arith.constant 0 : index
    %18 = vector.load %arg2[%c0_15, %c0_16] : memref<128x128xf32, #tpu.memory_space<vmem>>, vector<128x128xf32>
    %19 = math.log %18 : vector<128x128xf32>
    %cst_17 = arith.constant -3.40282347E+38 : f32
    %20 = vector.broadcast %cst_17 : f32 to vector<128x128xf32>
    %21 = arith.maximumf %19, %20 : vector<128x128xf32>
    %22 = arith.addf %17, %21 : vector<128x128xf32>
    %c0_18 = arith.constant 0 : index
    %c0_19 = arith.constant 0 : index
    %23 = vector.load %arg9[%c0_18, %c0_19] : memref<128x128xf32, #tpu.memory_space<vmem>>, vector<128x128xf32>
    tpu.vector_store %arg9[%c0_18, %c0_19], %22 {strides = array<i32>} : memref<128x128xf32, #tpu.memory_space<vmem>>, vector<128x128xf32>,
    return
  }
  func.func @transform_0(%arg0: i32) -> (i32, i32) {
    %c0_i32 = arith.constant 0 : i32
    %c0_i32_0 = arith.constant 0 : i32
    return %arg0, %c0_i32 : i32, i32
  }
  func.func @transform_1(%arg0: i32) -> (i32, i32) {
    %c0_i32 = arith.constant 0 : i32
    %c0_i32_0 = arith.constant 0 : i32
    return %arg0, %c0_i32 : i32, i32
  }
  func.func @transform_2(%arg0: i32) -> (i32, i32) {
    %c0_i32 = arith.constant 0 : i32
    %c0_i32_0 = arith.constant 0 : i32
    %c0_i32_1 = arith.constant 0 : i32
    return %c0_i32, %c0_i32_0 : i32, i32
  }
  func.func @transform_3(%arg0: i32) -> (i32, i32) {
    %c0_i32 = arith.constant 0 : i32
    %c0_i32_0 = arith.constant 0 : i32
    %c0_i32_1 = arith.constant 0 : i32
    return %c0_i32, %c0_i32_0 : i32, i32
  }
  func.func @transform_4(%arg0: i32) -> (i32, i32) {
    %c0_i32 = arith.constant 0 : i32
    %c0_i32_0 = arith.constant 0 : i32
    %c0_i32_1 = arith.constant 0 : i32
    return %c0_i32, %c0_i32_0 : i32, i32
  }
  func.func @transform_5(%arg0: i32) -> (i32, i32) {
    %c0_i32 = arith.constant 0 : i32
    %c0_i32_0 = arith.constant 0 : i32
    %c0_i32_1 = arith.constant 0 : i32
    return %c0_i32, %c0_i32_0 : i32, i32
  }
  func.func @transform_6(%arg0: i32) -> (i32, i32) {
    %c0_i32 = arith.constant 0 : i32
    %c0_i32_0 = arith.constant 0 : i32
    %c0_i32_1 = arith.constant 0 : i32
    return %c0_i32, %c0_i32_0 : i32, i32
  }
  func.func @transform_7(%arg0: i32) -> (i32, i32) {
    %c0_i32 = arith.constant 0 : i32
    %c0_i32_0 = arith.constant 0 : i32
    %c0_i32_1 = arith.constant 0 : i32
    return %c0_i32, %c0_i32_0 : i32, i32
  }
  func.func @transform_8(%arg0: i32) -> (i32, i32) {
    %c0_i32 = arith.constant 0 : i32
    %c0_i32_0 = arith.constant 0 : i32
    return %arg0, %c0_i32 : i32, i32
  }
}

</mosaic_0001>

<bundles_post_ra>
// kernel: action_mask_model_forward.1
= control target key start
LH: loop header
LB: loop body
LE: loop exit
PB: predicated region body
PF: predicated region fallthrough
CT: control target
= control target key end

     0   :  { %s1516_s27 = smov 0   ;;  %s1802_s0 = inlined_call_operand.vmem [shape: f32[256,128], index: 0, kind: input, shape index: {}]   ;;  %s1803_s1 = inlined_call_operand.vmem [shape: f32[256,128], index: 1, kind: input, shape index: {}]   ;;  %s1804_s2 = inlined_call_operand.vmem [shape: f32[128,128], index: 2, kind: input, shape index: {}]   ;;  %s1805_s3 = inlined_call_operand.vmem [shape: f32[1,128], index: 3, kind: input, shape index: {}]   ;;  %s1806_s4 = inlined_call_operand.vmem [shape: f32[128,128], index: 4, kind: input, shape index: {}]   ;;  %s1807_s5 = inlined_call_operand.vmem [shape: f32[1,128], index: 5, kind: input, shape index: {}]   ;;  %s1808_s6 = inlined_call_operand.vmem [shape: f32[128,128], index: 6, kind: input, shape index: {}]   ;;  %s1809_s7 = inlined_call_operand.vmem [shape: f32[1,128], index: 7, kind: input, shape index: {}]   ;;  %s1810_s8 = inlined_call_operand.vmem [shape: f32[256,128], index: 8, kind: output, shape index: {}]  }
   0x1 LB: > { %s1047_s28 = sadd.s32 4294967295, %s1469_s27   ;;  %p1051_p0 = scmp.ge.s32.totalorder %s1469_s27, 1  ;;  %s1469_s27 = sphi %s1516_s27, %s18_s27  }
   0x2   : > { %p274_p1 = scmp.lt.s32.totalorder %s1469_s27, 3 }
   0x4   : > { %p275_p2 = pnand %p1051_p0, %p274_p1 }
   0x5   : > { %s1052_s11 = sshll.u32 (!%p275_p2), %s1047_s28, 4 }
   0x6   : > { %278 = sbr.rel (%p275_p2) target bundleno = 696 (0x2b8), region = 52  ;;  %p314_p3 = scmp.lt.s32.totalorder (!%p275_p2), %s1052_s11, 31 }
   0xb   : > { %v362_v0 = vld [vmem:[%s1804_s2 + $0x78] sm:$0xff]  ;;  %v361_v1 = vld [vmem:[%s1804_s2 + $0x70] sm:$0xff]  ;;  %v360_v2 = vld [vmem:[%s1804_s2 + $0x68] sm:$0xff]  ;;  %s1812_s11 = smov (!%p314_p3, %s1052_s11), 31 }
   0xc   : > { %1159 = vmatprep.subr.mxu0 %v362_v0  ;;  %v359_v3 = vld [vmem:[%s1804_s2 + $0x60] sm:$0xff]  ;;  %s1536_s16 = sshll.u32 %s1812_s11, 3  ;;  %v546_v4 = vld [vmem:[%s1806_s4 + $0x78] sm:$0xff]  ;;  %v545_v6 = vld [vmem:[%s1806_s4 + $0x70] sm:$0xff] }
   0xd   : > { %1160 = vmatpush3.msra.mxu0 %v362_v0  ;;  %v358_v5 = vld [vmem:[%s1804_s2 + $0x58] sm:$0xff]  ;;  %s1548_s23 = scalar_lea.vmem %s1802_s0, %s1536_s16  ;;  %1215 = vmatprep.subr.mxu1 %v546_v4  ;;  %v357_v8 = vld [vmem:[%s1804_s2 + $0x50] sm:$0xff]  ;;  %v544_v9 = vld [vmem:[%s1806_s4 + $0x68] sm:$0xff]  ;;  %s1738_s14 = scalar_lea.vmem %s1803_s1, %s1536_s16 }
   0xe   : > { %1161 = vmatprep.subr.mxu0 %v361_v1  ;;  %v331_v7 = vld [vmem:[%s1548_s23] sm:$0xff]  ;;  %1216 = vmatpush3.msra.mxu1 %v546_v4  ;;  %v356_v10 = vld [vmem:[%s1804_s2 + $0x48] sm:$0xff]  ;;  %v542_v13 = vld [vmem:[%s1806_s4 + $0x58] sm:$0xff]  ;;  %s1763_s20 = scalar_lea.vmem %s1810_s8, %s1536_s16 }
   0xf   : > { %1162 = vmatpush3.msra.mxu0 %v361_v1  ;;  %1191 = vmatprep.mubr.f32.mxu0 %v331_v7  ;;  %v543_v11 = vld [vmem:[%s1806_s4 + $0x60] sm:$0xff]  ;;  %v354_v14 = vld [vmem:[%s1804_s2 + $0x38] sm:$0xff]  ;;  %v541_v15 = vld [vmem:[%s1806_s4 + $0x50] sm:$0xff] }
  0x10   : > { %1163 = vmatprep.subr.mxu0 %v360_v2  ;;  %1217 = vmatprep.subr.mxu1 %v545_v6  ;;  %v355_v12 = vld [vmem:[%s1804_s2 + $0x40] sm:$0xff]  ;;  %v353_v16 = vld [vmem:[%s1804_s2 + $0x30] sm:$0xff]  ;;  %v352_v17 = vld [vmem:[%s1804_s2 + $0x28] sm:$0xff] }
  0x11   : > { %1164 = vmatpush3.msra.mxu0 %v360_v2  ;;  %1218 = vmatpush3.msra.mxu1 %v545_v6  ;;  %v351_v18 = vld [vmem:[%s1804_s2 + $0x20] sm:$0xff]  ;;  %v350_v19 = vld [vmem:[%s1804_s2 + $0x18] sm:$0xff]  ;;  %v349_v20 = vld [vmem:[%s1804_s2 + $0x10] sm:$0xff] }
  0x12   : > { %1165 = vmatprep.subr.mxu0 %v359_v3  ;;  %1219 = vmatprep.subr.mxu1 %v544_v9  ;;  %v348_v21 = vld [vmem:[%s1804_s2 + $0x8] sm:$0xff]  ;;  %v347_v22 = vld [vmem:[%s1804_s2] sm:$0xff]  ;;  %v333_v24 = vld [vmem:[%s1548_s23 + $0x10] sm:$0xff] }
  0x13   : > { %1166 = vmatpush3.msra.mxu0 %v359_v3  ;;  %1220 = vmatpush3.msra.mxu1 %v544_v9  ;;  %v332_v23 = vld [vmem:[%s1548_s23 + $0x8] sm:$0xff]  ;;  %v334_v25 = vld [vmem:[%s1548_s23 + $0x18] sm:$0xff]  ;;  %v335_v26 = vld [vmem:[%s1548_s23 + $0x20] sm:$0xff] }
  0x14   : > { %1167 = vmatprep.subr.mxu0 %v358_v5  ;;  %1221 = vmatprep.subr.mxu1 %v543_v11  ;;  %v336_v27 = vld [vmem:[%s1548_s23 + $0x28] sm:$0xff]  ;;  %v337_v28 = vld [vmem:[%s1548_s23 + $0x30] sm:$0xff]  ;;  %v338_v29 = vld [vmem:[%s1548_s23 + $0x38] sm:$0xff] }
  0x15   : > { %1168 = vmatpush3.msra.mxu0 %v358_v5  ;;  %1222 = vmatpush3.msra.mxu1 %v543_v11  ;;  %v339_v30 = vld [vmem:[%s1548_s23 + $0x40] sm:$0xff]  ;;  %v340_v31 = vld [vmem:[%s1548_s23 + $0x48] sm:$0xff]  ;;  %v341_v32 = vld [vmem:[%s1548_s23 + $0x50] sm:$0xff] }
  0x16   : > { %1169 = vmatprep.subr.mxu0 %v357_v8  ;;  %1223 = vmatprep.subr.mxu1 %v542_v13  ;;  %v342_v33 = vld [vmem:[%s1548_s23 + $0x58] sm:$0xff]  ;;  %v343_v34 = vld [vmem:[%s1548_s23 + $0x60] sm:$0xff]  ;;  %v344_v35 = vld [vmem:[%s1548_s23 + $0x68] sm:$0xff] }
  0x17   : > { %1170 = vmatpush3.msra.mxu0 %v357_v8  ;;  %1224 = vmatpush3.msra.mxu1 %v542_v13  ;;  %v345_v36 = vld [vmem:[%s1548_s23 + $0x70] sm:$0xff]  ;;  %v346_v37 = vld [vmem:[%s1548_s23 + $0x78] sm:$0xff]  ;;  %v540_v38 = vld [vmem:[%s1806_s4 + $0x48] sm:$0xff] }
  0x18   : > { %1171 = vmatprep.subr.mxu0 %v356_v10  ;;  %1225 = vmatprep.subr.mxu1 %v541_v15  ;;  %v539_v39 = vld [vmem:[%s1806_s4 + $0x40] sm:$0xff]  ;;  %v538_v40 = vld [vmem:[%s1806_s4 + $0x38] sm:$0xff]  ;;  %v537_v41 = vld [vmem:[%s1806_s4 + $0x30] sm:$0xff] }
  0x19   : > { %1172 = vmatpush3.msra.mxu0 %v356_v10  ;;  %1226 = vmatpush3.msra.mxu1 %v541_v15  ;;  %v536_v42 = vld [vmem:[%s1806_s4 + $0x28] sm:$0xff]  ;;  %v535_v43 = vld [vmem:[%s1806_s4 + $0x20] sm:$0xff]  ;;  %v534_v44 = vld [vmem:[%s1806_s4 + $0x18] sm:$0xff] }
  0x1a   : > { %1173 = vmatprep.subr.mxu0 %v355_v12  ;;  %1227 = vmatprep.subr.mxu1 %v540_v38  ;;  %v533_v45 = vld [vmem:[%s1806_s4 + $0x10] sm:$0xff]  ;;  %v532_v46 = vld [vmem:[%s1806_s4 + $0x8] sm:$0xff]  ;;  %v531_v47 = vld [vmem:[%s1806_s4] sm:$0xff] }
  0x1b   : > { %1174 = vmatpush3.msra.mxu0 %v355_v12  ;;  %1228 = vmatpush3.msra.mxu1 %v540_v38  ;;  %v730_v48 = vld [vmem:[%s1808_s6 + $0x78] sm:$0xff]  ;;  %v729_v49 = vld [vmem:[%s1808_s6 + $0x70] sm:$0xff]  ;;  %v728_v50 = vld [vmem:[%s1808_s6 + $0x68] sm:$0xff] }
  0x1c   : > { %1175 = vmatprep.subr.mxu0 %v354_v14  ;;  %1229 = vmatprep.subr.mxu1 %v539_v39  ;;  %v1656_v51 = vld [vmem:[%s1808_s6 + $0x60] sm:$0xff]  ;;  %v1661_v52 = vld [vmem:[%s1808_s6 + $0x58] sm:$0xff]  ;;  %v1668_v53 = vld [vmem:[%s1808_s6 + $0x50] sm:$0xff] }
  0x1d   : > { %1176 = vmatpush3.msra.mxu0 %v354_v14  ;;  %1230 = vmatpush3.msra.mxu1 %v539_v39  ;;  %v1677_v54 = vld [vmem:[%s1805_s3] ss:$0 sm:$0xff]  ;;  %v724_v39 = vld [vmem:[%s1808_s6 + $0x48] sm:$0xff] }
  0x1e   : > { %1177 = vmatprep.subr.mxu0 %v353_v16  ;;  %1231 = vmatprep.subr.mxu1 %v538_v40 }
  0x1f   : > { %1178 = vmatpush3.msra.mxu0 %v353_v16  ;;  %1232 = vmatpush3.msra.mxu1 %v538_v40  ;;  %v723_v40 = vld [vmem:[%s1808_s6 + $0x40] sm:$0xff] }
  0x20   : > { %1179 = vmatprep.subr.mxu0 %v352_v17  ;;  %1233 = vmatprep.subr.mxu1 %v537_v41 }
  0x21   : > { %1180 = vmatpush3.msra.mxu0 %v352_v17  ;;  %1234 = vmatpush3.msra.mxu1 %v537_v41  ;;  %v722_v41 = vld [vmem:[%s1808_s6 + $0x38] sm:$0xff] }
  0x22   : > { %1181 = vmatprep.subr.mxu0 %v351_v18  ;;  %1235 = vmatprep.subr.mxu1 %v536_v42 }
  0x23   : > { %1182 = vmatpush3.msra.mxu0 %v351_v18  ;;  %1236 = vmatpush3.msra.mxu1 %v536_v42  ;;  %v721_v42 = vld [vmem:[%s1808_s6 + $0x30] sm:$0xff] }
  0x24   : > { %1183 = vmatprep.subr.mxu0 %v350_v19  ;;  %1237 = vmatprep.subr.mxu1 %v535_v43 }
  0x25   : > { %1184 = vmatpush3.msra.mxu0 %v350_v19  ;;  %1238 = vmatpush3.msra.mxu1 %v535_v43  ;;  %v720_v43 = vld [vmem:[%s1808_s6 + $0x28] sm:$0xff] }
  0x26   : > { %1185 = vmatprep.subr.mxu0 %v349_v20  ;;  %1239 = vmatprep.subr.mxu1 %v534_v44 }
  0x27   : > { %1186 = vmatpush3.msra.mxu0 %v349_v20  ;;  %1240 = vmatpush3.msra.mxu1 %v534_v44  ;;  %v719_v44 = vld [vmem:[%s1808_s6 + $0x20] sm:$0xff] }
  0x28   : > { %1187 = vmatprep.subr.mxu0 %v348_v21  ;;  %1241 = vmatprep.subr.mxu1 %v533_v45 }
  0x29   : > { %1188 = vmatpush3.msra.mxu0 %v348_v21  ;;  %1242 = vmatpush3.msra.mxu1 %v533_v45  ;;  %v718_v45 = vld [vmem:[%s1808_s6 + $0x18] sm:$0xff] }
  0x2a   : > { %1189 = vmatprep.subr.mxu0 %v347_v22  ;;  %1243 = vmatprep.subr.mxu1 %v532_v46 }
  0x2b   : > { %1190 = vmatpush3.msra.mxu0 %v347_v22  ;;  %1244 = vmatpush3.msra.mxu1 %v532_v46  ;;  %v717_v46 = vld [vmem:[%s1808_s6 + $0x10] sm:$0xff] }
  0x2c   : > { %1192 = vmatmul.mubr.f32.vlgmr.msra.gmra.mxu0 %v332_v23  ;;  %1245 = vmatprep.subr.mxu1 %v531_v47 }
  0x2d   : > { %1194 = vmatprep.mubr.f32.mxu0 %v333_v24  ;;  %1246 = vmatpush3.msra.mxu1 %v531_v47  ;;  %v716_v47 = vld [vmem:[%s1808_s6 + $0x8] sm:$0xff] }
  0x2e   : > { %1271 = vmatprep.subr.mxu0 %v730_v48  ;;  %1327 = vmatprep.subr.mxu1 %v730_v48 }
  0x2f   : > { %1272 = vmatpush3.msra.mxu0 %v730_v48 }
  0x30   : > { %1195 = vmatmul.mubr.f32.gmra.mxu0 %v334_v25  ;;  %1273 = vmatprep.subr.mxu0 %v729_v49 }
  0x31   : > { %1197 = vmatprep.mubr.f32.mxu0 %v335_v26  ;;  %1274 = vmatpush3.msra.mxu0 %v729_v49 }
  0x32   : > { %1275 = vmatprep.subr.mxu0 %v728_v50 }
  0x33   : > { %1276 = vmatpush3.msra.mxu0 %v728_v50 }
  0x34   : > { %1198 = vmatmul.mubr.f32.gmra.mxu0 %v336_v27  ;;  %1277 = vmatprep.subr.mxu0 %v1656_v51 }
  0x35   : > { %1200 = vmatprep.mubr.f32.mxu0 %v337_v28  ;;  %1278 = vmatpush3.msra.mxu0 %v1656_v51 }
  0x36   : > { %1279 = vmatprep.subr.mxu0 %v1661_v52 }
  0x37   : > { %1280 = vmatpush3.msra.mxu0 %v1661_v52 }
  0x38   : > { %1201 = vmatmul.mubr.f32.gmra.mxu0 %v338_v29  ;;  %1281 = vmatprep.subr.mxu0 %v1668_v53 }
  0x39   : > { %1203 = vmatprep.mubr.f32.mxu0 %v339_v30  ;;  %1282 = vmatpush3.msra.mxu0 %v1668_v53 }
  0x3a   : > { %1283 = vmatprep.subr.mxu0 %v724_v39 }
  0x3b   : > { %1284 = vmatpush3.msra.mxu0 %v724_v39 }
  0x3c   : > { %1204 = vmatmul.mubr.f32.gmra.mxu0 %v340_v31  ;;  %1285 = vmatprep.subr.mxu0 %v723_v40 }
  0x3d   : > { %1206 = vmatprep.mubr.f32.mxu0 %v341_v32  ;;  %1286 = vmatpush3.msra.mxu0 %v723_v40 }
  0x3e   : > { %1287 = vmatprep.subr.mxu0 %v722_v41 }
  0x3f   : > { %1288 = vmatpush3.msra.mxu0 %v722_v41 }
  0x40   : > { %1207 = vmatmul.mubr.f32.gmra.mxu0 %v342_v33  ;;  %1289 = vmatprep.subr.mxu0 %v721_v42 }
  0x41   : > { %1209 = vmatprep.mubr.f32.mxu0 %v343_v34  ;;  %1290 = vmatpush3.msra.mxu0 %v721_v42 }
  0x42   : > { %1291 = vmatprep.subr.mxu0 %v720_v43 }
  0x43   : > { %1292 = vmatpush3.msra.mxu0 %v720_v43 }
  0x44   : > { %1210 = vmatmul.mubr.f32.gmra.mxu0 %v344_v35  ;;  %1293 = vmatprep.subr.mxu0 %v719_v44 }
  0x45   : > { %1212 = vmatprep.mubr.f32.mxu0 %v345_v36  ;;  %1294 = vmatpush3.msra.mxu0 %v719_v44 }
  0x46   : > { %1295 = vmatprep.subr.mxu0 %v718_v45 }
  0x47   : > { %1296 = vmatpush3.msra.mxu0 %v718_v45 }
  0x48   : > { %1213 = vmatmul.mubr.f32.gmra.mxu0 %v346_v37  ;;  %1297 = vmatprep.subr.mxu0 %v717_v46 }
  0x49   : > { %1298 = vmatpush3.msra.mxu0 %v717_v46 }
  0x4a   : > { %1299 = vmatprep.subr.mxu0 %v716_v47 }
  0x4b   : > { %1300 = vmatpush3.msra.mxu0 %v716_v47 }
  0xec   : > { %v1193_v55 = vpop.f32.mrf.mxu0 }
  0xed   : > { %v442_v56 = vadd.f32 %v1193_v55, %v1677_v54 }
  0xee   : > { %v436_v57 = vpop.f32.mrf.mxu0 }
  0xef   : > { %v437_v58 = vadd.f32 %v1677_v54, %v436_v57 }
  0xf0   : > { %v1196_v59 = vpop.f32.mrf.mxu0 }
  0xf1   : > { %1367 = vtanh.f32 %v437_v58  ;;  %v452_v60 = vadd.f32 %v1196_v59, %v1677_v54 }
  0xf2   : > { %1369 = vtanh.f32 %v442_v56  ;;  %v446_v61 = vpop.f32.mrf.mxu0 }
  0xf3   : > { %v447_v62 = vadd.f32 %v1677_v54, %v446_v61 }
  0xf4   : > { %v1199_v63 = vpop.f32.mrf.mxu0 }
  0xf5   : > { %1371 = vtanh.f32 %v447_v62  ;;  %v462_v0 = vadd.f32 %v1199_v63, %v1677_v54 }
  0xf6   : > { %1373 = vtanh.f32 %v452_v60  ;;  %v456_v1 = vpop.f32.mrf.mxu0 }
  0xf7   : > { %v457_v2 = vadd.f32 %v1677_v54, %v456_v1 }
  0xf8   : > { %v1202_v3 = vpop.f32.mrf.mxu0 }
  0xf9   : > { %1375 = vtanh.f32 %v457_v2  ;;  %v472_v4 = vadd.f32 %v1202_v3, %v1677_v54 }
  0xfa   : > { %1377 = vtanh.f32 %v462_v0  ;;  %v466_v5 = vpop.f32.mrf.mxu0 }
  0xfb   : > { %v467_v6 = vadd.f32 %v1677_v54, %v466_v5 }
  0xfc   : > { %v1205_v7 = vpop.f32.mrf.mxu0 }
  0xfd   : > { %1379 = vtanh.f32 %v467_v6  ;;  %v482_v9 = vadd.f32 %v1205_v7, %v1677_v54 }
  0xfe   : > { %v1368_v8 = vpop.eup %1367  ;;  %1381 = vtanh.f32 %v472_v4  ;;  %v476_v10 = vpop.f32.mrf.mxu0 }
  0xff   : > { %v1370_v11 = vpop.eup %1369  ;;  %v477_v12 = vadd.f32 %v1677_v54, %v476_v10  ;;  %1247 = vmatprep.mubr.f32.mxu1 %v1368_v8 }
 0x100   : > { %v1208_v13 = vpop.f32.mrf.mxu0  ;;  %1248 = vmatmul.mubr.f32.vlgmr.msra.gmra.mxu1 %v1370_v11 }
 0x101   : > { %1383 = vtanh.f32 %v477_v12  ;;  %1343 = vmatpush3.msra.mxu1 %v730_v48  ;;  %v492_v15 = vadd.f32 %v1208_v13, %v1677_v54  ;;  %v715_v48 = vld [vmem:[%s1808_s6] sm:$0xff] }
 0x102   : > { %v1372_v14 = vpop.eup %1371  ;;  %1385 = vtanh.f32 %v482_v9  ;;  %v486_v16 = vpop.f32.mrf.mxu0  ;;  %1328 = vmatprep.subr.mxu1 %v729_v49  ;;  %1301 = vmatprep.subr.mxu0 %v715_v48 }
 0x103   : > { %v1374_v17 = vpop.eup %1373  ;;  %v487_v18 = vadd.f32 %v1677_v54, %v486_v16  ;;  %1250 = vmatprep.mubr.f32.mxu1 %v1372_v14  ;;  %1344 = vmatpush3.msra.mxu1 %v729_v49  ;;  %v1059_v49 = vld [vmem:[%s1807_s5] ss:$0 sm:$0xff] }
 0x104   : > { %v1211_v19 = vpop.f32.mrf.mxu0  ;;  %1251 = vmatmul.mubr.f32.gmra.mxu1 %v1374_v17  ;;  %1329 = vmatprep.subr.mxu1 %v728_v50 }
 0x105   : > { %1387 = vtanh.f32 %v487_v18  ;;  %1345 = vmatpush3.msra.mxu1 %v728_v50  ;;  %v502_v21 = vadd.f32 %v1211_v19, %v1677_v54  ;;  %1302 = vmatpush3.msra.mxu0 %v715_v48 }
 0x106   : > { %v1376_v20 = vpop.eup %1375  ;;  %1389 = vtanh.f32 %v492_v15  ;;  %v496_v22 = vpop.f32.mrf.mxu0  ;;  %1330 = vmatprep.subr.mxu1 %v1656_v51 }
 0x107   : > { %v1378_v23 = vpop.eup %1377  ;;  %v497_v24 = vadd.f32 %v1677_v54, %v496_v22  ;;  %1253 = vmatprep.mubr.f32.mxu1 %v1376_v20  ;;  %1346 = vmatpush3.msra.mxu1 %v1656_v51 }
 0x108   : > { %v1214_v25 = vpop.f32.mrf.mxu0  ;;  %1254 = vmatmul.mubr.f32.gmra.mxu1 %v1378_v23  ;;  %1331 = vmatprep.subr.mxu1 %v1661_v52 }
 0x109   : > { %1391 = vtanh.f32 %v497_v24  ;;  %1347 = vmatpush3.msra.mxu1 %v1661_v52  ;;  %v512_v27 = vadd.f32 %v1214_v25, %v1677_v54 }
 0x10a   : > { %v1380_v26 = vpop.eup %1379  ;;  %1393 = vtanh.f32 %v502_v21  ;;  %v506_v28 = vpop.f32.mrf.mxu0  ;;  %1332 = vmatprep.subr.mxu1 %v1668_v53 }
 0x10b   : > { %v1382_v29 = vpop.eup %1381  ;;  %v507_v30 = vadd.f32 %v1677_v54, %v506_v28  ;;  %1256 = vmatprep.mubr.f32.mxu1 %v1380_v26  ;;  %1348 = vmatpush3.msra.mxu1 %v1668_v53 }
 0x10c   : > { %1257 = vmatmul.mubr.f32.gmra.mxu1 %v1382_v29  ;;  %1333 = vmatprep.subr.mxu1 %v724_v39 }
 0x10d   : > { %1395 = vtanh.f32 %v507_v30  ;;  %1349 = vmatpush3.msra.mxu1 %v724_v39  ;;  %v887_v39 = vld [vmem:[%s1738_s14 + $0x20] sm:$0xff] }
 0x10e   : > { %v1384_v31 = vpop.eup %1383  ;;  %1397 = vtanh.f32 %v512_v27  ;;  %1334 = vmatprep.subr.mxu1 %v723_v40 }
 0x10f   : > { %v1386_v32 = vpop.eup %1385  ;;  %1259 = vmatprep.mubr.f32.mxu1 %v1384_v31  ;;  %1350 = vmatpush3.msra.mxu1 %v723_v40  ;;  %v890_v40 = vld [vmem:[%s1738_s14 + $0x38] sm:$0xff] }
 0x110   : > { %1260 = vmatmul.mubr.f32.gmra.mxu1 %v1386_v32  ;;  %1335 = vmatprep.subr.mxu1 %v722_v41 }
 0x111   : > { %1351 = vmatpush3.msra.mxu1 %v722_v41  ;;  %v889_v41 = vld [vmem:[%s1738_s14 + $0x30] sm:$0xff] }
 0x112   : > { %v1388_v33 = vpop.eup %1387  ;;  %1336 = vmatprep.subr.mxu1 %v721_v42 }
 0x113   : > { %v1390_v34 = vpop.eup %1389  ;;  %1262 = vmatprep.mubr.f32.mxu1 %v1388_v33  ;;  %1352 = vmatpush3.msra.mxu1 %v721_v42 }
 0x114   : > { %1263 = vmatmul.mubr.f32.gmra.mxu1 %v1390_v34  ;;  %1337 = vmatprep.subr.mxu1 %v720_v43  ;;  %v884_v34 = vld [vmem:[%s1738_s14 + $0x8] sm:$0xff] }
 0x115   : > { %1353 = vmatpush3.msra.mxu1 %v720_v43  ;;  %v892_v43 = vld [vmem:[%s1738_s14 + $0x48] sm:$0xff] }
 0x116   : > { %v1392_v35 = vpop.eup %1391  ;;  %1338 = vmatprep.subr.mxu1 %v719_v44 }
 0x117   : > { %v1394_v36 = vpop.eup %1393  ;;  %1265 = vmatprep.mubr.f32.mxu1 %v1392_v35  ;;  %1354 = vmatpush3.msra.mxu1 %v719_v44  ;;  %v883_v35 = vld [vmem:[%s1738_s14] sm:$0xff] }
 0x118   : > { %1266 = vmatmul.mubr.f32.gmra.mxu1 %v1394_v36  ;;  %1339 = vmatprep.subr.mxu1 %v718_v45  ;;  %v886_v36 = vld [vmem:[%s1738_s14 + $0x18] sm:$0xff] }
 0x119   : > { %1355 = vmatpush3.msra.mxu1 %v718_v45  ;;  %v891_v45 = vld [vmem:[%s1738_s14 + $0x40] sm:$0xff] }
 0x11a   : > { %v1396_v37 = vpop.eup %1395  ;;  %1340 = vmatprep.subr.mxu1 %v717_v46 }
 0x11b   : > { %v1398_v38 = vpop.eup %1397  ;;  %1268 = vmatprep.mubr.f32.mxu1 %v1396_v37  ;;  %1356 = vmatpush3.msra.mxu1 %v717_v46  ;;  %v885_v37 = vld [vmem:[%s1738_s14 + $0x10] sm:$0xff] }
 0x11c   : > { %1269 = vmatmul.mubr.f32.gmra.mxu1 %v1398_v38  ;;  %1341 = vmatprep.subr.mxu1 %v716_v47  ;;  %v888_v38 = vld [vmem:[%s1738_s14 + $0x28] sm:$0xff] }
 0x11d   : > { %1357 = vmatpush3.msra.mxu1 %v716_v47 }
 0x11e   : > { %1342 = vmatprep.subr.mxu1 %v715_v48 }
 0x11f   : > { %1358 = vmatpush3.msra.mxu1 %v715_v48  ;;  %v894_v48 = vld [vmem:[%s1738_s14 + $0x58] sm:$0xff] }
 0x1c0   : > { %v1249_v50 = vpop.f32.mrf.mxu1 }
 0x1c1   : > { %v626_v51 = vadd.f32 %v1249_v50, %v1059_v49 }
 0x1c2   : > { %v620_v52 = vpop.f32.mrf.mxu1 }
 0x1c3   : > { %v621_v53 = vadd.f32 %v1059_v49, %v620_v52  ;;  %v893_v52 = vld [vmem:[%s1738_s14 + $0x50] sm:$0xff] }
 0x1c4   : > { %v1252_v54 = vpop.f32.mrf.mxu1 }
 0x1c5   : > { %1399 = vtanh.f32 %v621_v53  ;;  %v636_v55 = vadd.f32 %v1252_v54, %v1059_v49 }
 0x1c6   : > { %1401 = vtanh.f32 %v626_v51  ;;  %v630_v56 = vpop.f32.mrf.mxu1  ;;  %v1754_v51 = vld [vmem:[%s1809_s7] ss:$0 sm:$0xff] }
 0x1c7   : > { %v631_v57 = vadd.f32 %v1059_v49, %v630_v56 }
 0x1c8   : > { %v1255_v58 = vpop.f32.mrf.mxu1 }
 0x1c9   : > { %1403 = vtanh.f32 %v631_v57  ;;  %v646_v59 = vadd.f32 %v1255_v58, %v1059_v49  ;;  %v896_v57 = vld [vmem:[%s1738_s14 + $0x68] sm:$0xff] }
 0x1ca   : > { %1405 = vtanh.f32 %v636_v55  ;;  %v640_v60 = vpop.f32.mrf.mxu1 }
 0x1cb   : > { %v641_v61 = vadd.f32 %v1059_v49, %v640_v60 }
 0x1cc   : > { %v1258_v62 = vpop.f32.mrf.mxu1 }
 0x1cd   : > { %1407 = vtanh.f32 %v641_v61  ;;  %v656_v63 = vadd.f32 %v1258_v62, %v1059_v49 }
 0x1ce   : > { %1409 = vtanh.f32 %v646_v59  ;;  %v650_v0 = vpop.f32.mrf.mxu1 }
 0x1cf   : > { %v651_v1 = vadd.f32 %v1059_v49, %v650_v0  ;;  %v895_v0 = vld [vmem:[%s1738_s14 + $0x60] sm:$0xff] }
 0x1d0   : > { %v1261_v2 = vpop.f32.mrf.mxu1 }
 0x1d1   : > { %1411 = vtanh.f32 %v651_v1  ;;  %v666_v4 = vadd.f32 %v1261_v2, %v1059_v49 }
 0x1d2   : > { %v1400_v3 = vpop.eup %1399  ;;  %1413 = vtanh.f32 %v656_v63  ;;  %v660_v5 = vpop.f32.mrf.mxu1 }
 0x1d3   : > { %v1402_v6 = vpop.eup %1401  ;;  %v661_v7 = vadd.f32 %v1059_v49, %v660_v5  ;;  %1303 = vmatprep.mubr.f32.mxu0 %v1400_v3 }
 0x1d4   : > { %v1264_v8 = vpop.f32.mrf.mxu1  ;;  %1304 = vmatmul.mubr.f32.vlgmr.msra.gmra.mxu0 %v1402_v6 }
 0x1d5   : > { %1415 = vtanh.f32 %v661_v7  ;;  %v676_v10 = vadd.f32 %v1264_v8, %v1059_v49  ;;  %v898_v7 = vld [vmem:[%s1738_s14 + $0x78] sm:$0xff] }
 0x1d6   : > { %v1404_v9 = vpop.eup %1403  ;;  %1417 = vtanh.f32 %v666_v4  ;;  %v670_v11 = vpop.f32.mrf.mxu1 }
 0x1d7   : > { %v1406_v12 = vpop.eup %1405  ;;  %v671_v13 = vadd.f32 %v1059_v49, %v670_v11  ;;  %1306 = vmatprep.mubr.f32.mxu0 %v1404_v9 }
 0x1d8   : > { %v1267_v14 = vpop.f32.mrf.mxu1  ;;  %1307 = vmatmul.mubr.f32.gmra.mxu0 %v1406_v12 }
 0x1d9   : > { %1419 = vtanh.f32 %v671_v13  ;;  %v686_v16 = vadd.f32 %v1267_v14, %v1059_v49  ;;  %v897_v14 = vld [vmem:[%s1738_s14 + $0x70] sm:$0xff] }
 0x1da   : > { %v1408_v15 = vpop.eup %1407  ;;  %1421 = vtanh.f32 %v676_v10  ;;  %v680_v17 = vpop.f32.mrf.mxu1 }
 0x1db   : > { %v1410_v18 = vpop.eup %1409  ;;  %v681_v19 = vadd.f32 %v1059_v49, %v680_v17  ;;  %1309 = vmatprep.mubr.f32.mxu0 %v1408_v15 }
 0x1dc   : > { %v1270_v20 = vpop.f32.mrf.mxu1  ;;  %1310 = vmatmul.mubr.f32.gmra.mxu0 %v1410_v18 }
 0x1dd   : > { %1423 = vtanh.f32 %v681_v19  ;;  %v696_v22 = vadd.f32 %v1270_v20, %v1059_v49 }
 0x1de   : > { %v1412_v21 = vpop.eup %1411  ;;  %1425 = vtanh.f32 %v686_v16  ;;  %v690_v23 = vpop.f32.mrf.mxu1 }
 0x1df   : > { %v1414_v24 = vpop.eup %1413  ;;  %v691_v25 = vadd.f32 %v1059_v49, %v690_v23  ;;  %1312 = vmatprep.mubr.f32.mxu0 %v1412_v21 }
 0x1e0   : > { %1313 = vmatmul.mubr.f32.gmra.mxu0 %v1414_v24 }
 0x1e1   : > { %1427 = vtanh.f32 %v691_v25 }
 0x1e2   : > { %v1416_v26 = vpop.eup %1415  ;;  %1429 = vtanh.f32 %v696_v22 }
 0x1e3   : > { %v1418_v27 = vpop.eup %1417  ;;  %1315 = vmatprep.mubr.f32.mxu1 %v1416_v26  ;;  %1431 = vlog2.f32 %v884_v34 }
 0x1e4   : > { %1316 = vmatmul.mubr.f32.vlgmr.msra.gmra.mxu1 %v1418_v27  ;;  %1433 = vlog2.f32 %v883_v35 }
 0x1e5   : > { %1435 = vlog2.f32 %v886_v36 }
 0x1e6   : > { %v1420_v28 = vpop.eup %1419  ;;  %1437 = vlog2.f32 %v885_v37 }
 0x1e7   : > { %v1422_v29 = vpop.eup %1421  ;;  %1318 = vmatprep.mubr.f32.mxu1 %v1420_v28  ;;  %1439 = vlog2.f32 %v888_v38 }
 0x1e8   : > { %1319 = vmatmul.mubr.f32.gmra.mxu1 %v1422_v29  ;;  %1441 = vlog2.f32 %v887_v39 }
 0x1e9   : > { %1443 = vlog2.f32 %v890_v40 }
 0x1ea   : > { %v1424_v30 = vpop.eup %1423  ;;  %1445 = vlog2.f32 %v889_v41 }
 0x1eb   : > { %v1426_v31 = vpop.eup %1425  ;;  %1321 = vmatprep.mubr.f32.mxu1 %v1424_v30  ;;  %1447 = vlog2.f32 %v892_v43 }
 0x1ec   : > { %1322 = vmatmul.mubr.f32.gmra.mxu1 %v1426_v31  ;;  %1449 = vlog2.f32 %v891_v45 }
 0x1ed   : > { %1451 = vlog2.f32 %v894_v48 }
 0x1ee   : > { %v1428_v32 = vpop.eup %1427  ;;  %1453 = vlog2.f32 %v893_v52 }
 0x1ef   : > { %v1430_v33 = vpop.eup %1429  ;;  %1324 = vmatprep.mubr.f32.mxu1 %v1428_v32  ;;  %1455 = vlog2.f32 %v896_v57 }
 0x1f0   : > { %1325 = vmatmul.mubr.f32.gmra.mxu1 %v1430_v33  ;;  %v1432_v42 = vpop.eup %1431  ;;  %1457 = vlog2.f32 %v895_v0 }
 0x1f1   : > { %v1434_v44 = vpop.eup %1433  ;;  %v902_v46 = vmul.f32 0.6931472, %v1432_v42  ;;  %1459 = vlog2.f32 %v898_v7 }
 0x1f2   : > { %v1436_v47 = vpop.eup %1435  ;;  %v900_v49 = vmul.f32 0.6931472, %v1434_v44  ;;  %1461 = vlog2.f32 %v897_v14 }
 0x1f3   : > { %v1438_v50 = vpop.eup %1437  ;;  %v932_v54 = vmax.f32 %v902_v46, -3.4028235e+38  ;;  %v906_v55 = vmul.f32 0.6931472, %v1436_v47 }
 0x1f4   : > { %v1440_v53 = vpop.eup %1439  ;;  %v931_v60 = vmax.f32 %v900_v49, -3.4028235e+38  ;;  %v904_v61 = vmul.f32 0.6931472, %v1438_v50 }
 0x1f5   : > { %v1442_v58 = vpop.eup %1441  ;;  %v910_v63 = vmul.f32 0.6931472, %v1440_v53  ;;  %v934_v3 = vmax.f32 %v906_v55, -3.4028235e+38 }
 0x1f6   : > { %v1444_v4 = vpop.eup %1443  ;;  %v908_v6 = vmul.f32 0.6931472, %v1442_v58  ;;  %v933_v10 = vmax.f32 %v904_v61, -3.4028235e+38 }
 0x1f7   : > { %v1446_v11 = vpop.eup %1445  ;;  %v936_v13 = vmax.f32 %v910_v63, -3.4028235e+38  ;;  %v914_v17 = vmul.f32 0.6931472, %v1444_v4 }
 0x1f8   : > { %v1448_v18 = vpop.eup %1447  ;;  %v935_v20 = vmax.f32 %v908_v6, -3.4028235e+38  ;;  %v912_v23 = vmul.f32 0.6931472, %v1446_v11 }
 0x1f9   : > { %v1450_v24 = vpop.eup %1449  ;;  %v938_v28 = vmax.f32 %v914_v17, -3.4028235e+38  ;;  %v918_v29 = vmul.f32 0.6931472, %v1448_v18 }
 0x1fa   : > { %v1452_v30 = vpop.eup %1451  ;;  %v937_v34 = vmax.f32 %v912_v23, -3.4028235e+38  ;;  %v916_v35 = vmul.f32 0.6931472, %v1450_v24 }
 0x1fb   : > { %v1454_v36 = vpop.eup %1453  ;;  %v940_v40 = vmax.f32 %v918_v29, -3.4028235e+38  ;;  %v922_v41 = vmul.f32 0.6931472, %v1452_v30 }
 0x1fc   : > { %v1456_v42 = vpop.eup %1455  ;;  %v939_v46 = vmax.f32 %v916_v35, -3.4028235e+38  ;;  %v920_v47 = vmul.f32 0.6931472, %v1454_v36 }
 0x1fd   : > { %v1458_v48 = vpop.eup %1457  ;;  %v942_v53 = vmax.f32 %v922_v41, -3.4028235e+38 }
 0x1fe   : > { %v1460_v55 = vpop.eup %1459 }
 0x1ff   : > { %v1462_v61 = vpop.eup %1461 }
 0x200   : > { %v928_v7 = vmul.f32 0.6931472, %v1462_v61 }
 0x294   : > { %v1305_v56 = vpop.f32.mrf.mxu0 }
 0x295   : > { %v810_v59 = vadd.f32 %v1305_v56, %v1754_v51 }
 0x296   : > { %v804_v62 = vpop.f32.mrf.mxu0 }
 0x297   : > { %v948_v1 = vadd.f32 %v932_v54, %v810_v59  ;;  %v805_v2 = vadd.f32 %v1754_v51, %v804_v62  ;;  %v926_v54 = vmul.f32 0.6931472, %v1456_v42  ;;  %v941_v59 = vmax.f32 %v920_v47, -3.4028235e+38 }
 0x298   : > { %v1308_v5 = vpop.f32.mrf.mxu0 }
 0x299   : > { %964 = vst [vmem:[%s1763_s20 + $0x8] sm:$0xff] %v948_v1  ;;  %v947_v8 = vadd.f32 %v931_v60, %v805_v2  ;;  %v820_v9 = vadd.f32 %v1308_v5, %v1754_v51  ;;  %v924_v60 = vmul.f32 0.6931472, %v1458_v48  ;;  %v944_v1 = vmax.f32 %v926_v54, -3.4028235e+38 }
 0x29a   : > { %v814_v12 = vpop.f32.mrf.mxu0  ;;  %v930_v2 = vmul.f32 0.6931472, %v1460_v55 }
 0x29b   : > { %963 = vst [vmem:[%s1763_s20] sm:$0xff] %v947_v8  ;;  %v950_v15 = vadd.f32 %v934_v3, %v820_v9  ;;  %v815_v16 = vadd.f32 %v1754_v51, %v814_v12  ;;  %v943_v6 = vmax.f32 %v924_v60, -3.4028235e+38 }
 0x29c   : > { %v1311_v19 = vpop.f32.mrf.mxu0  ;;  %v946_v11 = vmax.f32 %v930_v2, -3.4028235e+38 }
 0x29d   : > { %966 = vst [vmem:[%s1763_s20 + $0x18] sm:$0xff] %v950_v15  ;;  %v949_v21 = vadd.f32 %v933_v10, %v815_v16  ;;  %v830_v22 = vadd.f32 %v1311_v19, %v1754_v51  ;;  %v945_v15 = vmax.f32 %v928_v7, -3.4028235e+38 }
 0x29e   : > { %v824_v25 = vpop.f32.mrf.mxu0 }
 0x29f   : > { %965 = vst [vmem:[%s1763_s20 + $0x10] sm:$0xff] %v949_v21  ;;  %v952_v26 = vadd.f32 %v936_v13, %v830_v22  ;;  %v825_v27 = vadd.f32 %v1754_v51, %v824_v25 }
 0x2a0   : > { %v1314_v31 = vpop.f32.mrf.mxu0 }
 0x2a1   : > { %968 = vst [vmem:[%s1763_s20 + $0x28] sm:$0xff] %v952_v26  ;;  %v951_v32 = vadd.f32 %v935_v20, %v825_v27  ;;  %v840_v33 = vadd.f32 %v1314_v31, %v1754_v51 }
 0x2a2   : > { %v834_v37 = vpop.f32.mrf.mxu0 }
 0x2a3   : > { %967 = vst [vmem:[%s1763_s20 + $0x20] sm:$0xff] %v951_v32  ;;  %v954_v38 = vadd.f32 %v938_v28, %v840_v33  ;;  %v835_v39 = vadd.f32 %v1754_v51, %v834_v37 }
 0x2a4   : > { %v1317_v43 = vpop.f32.mrf.mxu1 }
 0x2a5   : > { %970 = vst [vmem:[%s1763_s20 + $0x38] sm:$0xff] %v954_v38  ;;  %v953_v44 = vadd.f32 %v937_v34, %v835_v39  ;;  %v850_v45 = vadd.f32 %v1317_v43, %v1754_v51 }
 0x2a6   : > { %v844_v49 = vpop.f32.mrf.mxu1 }
 0x2a7   : > { %969 = vst [vmem:[%s1763_s20 + $0x30] sm:$0xff] %v953_v44  ;;  %v956_v50 = vadd.f32 %v940_v40, %v850_v45  ;;  %v845_v52 = vadd.f32 %v1754_v51, %v844_v49 }
 0x2a8   : > { %v1320_v56 = vpop.f32.mrf.mxu1 }
 0x2a9   : > { %972 = vst [vmem:[%s1763_s20 + $0x48] sm:$0xff] %v956_v50  ;;  %v955_v57 = vadd.f32 %v939_v46, %v845_v52  ;;  %v860_v58 = vadd.f32 %v1320_v56, %v1754_v51 }
 0x2aa   : > { %v854_v62 = vpop.f32.mrf.mxu1 }
 0x2ab   : > { %971 = vst [vmem:[%s1763_s20 + $0x40] sm:$0xff] %v955_v57  ;;  %v958_v63 = vadd.f32 %v942_v53, %v860_v58  ;;  %v855_v0 = vadd.f32 %v1754_v51, %v854_v62 }
 0x2ac   : > { %v1323_v3 = vpop.f32.mrf.mxu1 }
 0x2ad   : > { %974 = vst [vmem:[%s1763_s20 + $0x58] sm:$0xff] %v958_v63  ;;  %v957_v4 = vadd.f32 %v941_v59, %v855_v0  ;;  %v870_v5 = vadd.f32 %v1323_v3, %v1754_v51 }
 0x2ae   : > { %v864_v8 = vpop.f32.mrf.mxu1 }
 0x2af   : > { %973 = vst [vmem:[%s1763_s20 + $0x50] sm:$0xff] %v957_v4  ;;  %v960_v9 = vadd.f32 %v944_v1, %v870_v5  ;;  %v865_v10 = vadd.f32 %v1754_v51, %v864_v8 }
 0x2b0   : > { %v1326_v12 = vpop.f32.mrf.mxu1 }
 0x2b1   : > { %976 = vst [vmem:[%s1763_s20 + $0x68] sm:$0xff] %v960_v9  ;;  %v959_v13 = vadd.f32 %v943_v6, %v865_v10  ;;  %v880_v14 = vadd.f32 %v1326_v12, %v1754_v51 }
 0x2b2   : > { %v874_v16 = vpop.f32.mrf.mxu1 }
 0x2b3   : > { %975 = vst [vmem:[%s1763_s20 + $0x60] sm:$0xff] %v959_v13  ;;  %v962_v17 = vadd.f32 %v946_v11, %v880_v14  ;;  %v875_v18 = vadd.f32 %v1754_v51, %v874_v16 }
 0x2b5   : > { %978 = vst [vmem:[%s1763_s20 + $0x78] sm:$0xff] %v962_v17  ;;  %v961_v19 = vadd.f32 %v945_v15, %v875_v18 }
 0x2b7   : > { %977 = vst [vmem:[%s1763_s20 + $0x70] sm:$0xff] %v961_v19 }
 0x2b8 PF: > { %s18_s27 = sadd.s32 1, %s1469_s27  }
 0x2b9   : > { %p15_p4 = scmp.ge.s32.totalorder %s18_s27, 4  }
 0x2bb   :  { %17 = sbr.rel (!%p15_p4) target bundleno = 1 (0x1), region = 85 }

</bundles_post_ra>
